<compile_context>
chip_gen: v6e
topology: v6e:2x2x1
jax: 0.10.0
libtpu: 0.0.40
codegen_flags: <defaults>
</compile_context>

<pallas_src>
import numpy as np
import jax
import jax.numpy as jnp
from jax.experimental import pallas as pl
from jax.experimental.pallas import tpu as pltpu


def calc_coeff(iter_num, high=1.0, low=0.0, alpha=10.0, max_iter=10000.0):
    # Mirrors the PyTorch helper (forward output does not depend on it).
    return float(2.0 * (high - low) / (1.0 + np.exp(-alpha * iter_num / max_iter))
                 - (high - low) + low)


def _round_up(n, m):
    return ((n + m - 1) // m) * m


# ---------------------------------------------------------------------------
# Kernels
# ---------------------------------------------------------------------------

def _finish(h1_f32, w2_ref, b2_ref, w3_ref, b3_ref, y_ref):
    """Shared tail: layer2 (MXU) + relu + layer3 (VPU/XLU) + sigmoid (EUP)."""
    cdt = w2_ref.dtype
    h2 = jnp.dot(h1_f32.astype(cdt), w2_ref[...],
                 preferred_element_type=jnp.float32) + b2_ref[...]
    h2 = jnp.maximum(h2, 0.0)                       # relu2 (dropout2 = identity in eval)
    # Layer 3 (H -> 1): VPU multiply against the w3 row + XLU lane reduction.
    logits = jnp.sum(h2 * w3_ref[...], axis=-1, keepdims=True) + b3_ref[0, 0]
    y_ref[...] = jax.nn.sigmoid(logits)             # EUP sigmoid in f32


def _mlp_kernel(x_ref, w1_ref, b1_ref, w2_ref, b2_ref, w3_ref, b3_ref, y_ref):
    """Fast path: W1/W2 fully VMEM-resident, one (tb, Fp) batch tile per step."""
    cdt = w1_ref.dtype
    h1 = jnp.dot(x_ref[...].astype(cdt), w1_ref[...],
                 preferred_element_type=jnp.float32) + b1_ref[...]
    h1 = jnp.maximum(h1, 0.0)                       # relu1 (dropout1 = identity in eval)
    _finish(h1, w2_ref, b2_ref, w3_ref, b3_ref, y_ref)


def _mlp_kernel_ktiled(x_ref, w1_ref, b1_ref, w2_ref, b2_ref, w3_ref, b3_ref,
                       y_ref, acc_ref):
    """Fallback: W1 does not fit in VMEM -> reduction grid axis over F (tiles of
    size tf), f32 accumulator in scratch, layer2/3 only on the last K step."""
    k = pl.program_id(1)
    cdt = w1_ref.dtype

    @pl.when(k == 0)
    def _():
        acc_ref[...] = jnp.zeros_like(acc_ref)

    acc_ref[...] += jnp.dot(x_ref[...].astype(cdt), w1_ref[...],
                            preferred_element_type=jnp.float32)

    @pl.when(k == pl.num_programs(1) - 1)
    def _():
        h1 = jnp.maximum(acc_ref[...] + b1_ref[...], 0.0)
        _finish(h1, w2_ref, b2_ref, w3_ref, b3_ref, y_ref)


# ---------------------------------------------------------------------------
# Tiling / resource selection
# ---------------------------------------------------------------------------

def _vmem_budget_bytes():
    """~75% of physical VMEM: ~96 MiB on v5e/v6e (128 MiB), ~48 MiB on v7x (64 MiB)."""
    try:
        phys = int(pltpu.get_tpu_info().vmem_capacity_bytes)
        if phys <= 0:
            raise ValueError
    except Exception:
        phys = 128 * 1024 * 1024
    return (phys * 3) // 4


def _vmem_estimate(tb, tf, Fp, Hp, x_item, c_item, k_tiled):
    w1 = (2 if k_tiled else 1) * tf * Hp * c_item   # streamed (2 bufs) vs Buffered(1) resident
    w2 = Hp * Hp * c_item                           # Buffered(1) resident
    bias = 3 * Hp * 4 + 512                         # b1, b2, w3 rows (b3 lives in SMEM)
    x_stream = 2 * tb * tf * x_item                 # double-buffered x tile
    y_stream = 2 * tb * 128 * 4                     # output tile (lane-padded), double-buffered
    acts = 4 * tb * Hp * 4                          # h1/h2 f32 slabs + low-precision copies
    acc = tb * Hp * 4 if k_tiled else 0             # K-tiling accumulator scratch
    return w1 + w2 + bias + x_stream + y_stream + acts + acc


def _choose_tiling(B, Fp, Hp, x_item, c_item, budget, block_b, max_f_tile=None):
    tb_align = 16                                   # bf16 packs 2 rows/sublane
    if B <= block_b:
        tb_candidates = [_round_up(B, tb_align)]
    else:
        cap = max(128, (block_b // 128) * 128)
        tb_candidates = list(range(cap, 0, -128))   # lane-multiple batch tiles

    tf_candidates = [Fp]
    tf = Fp // 2
    while tf >= 128 and tf % 128 == 0 and Fp % tf == 0:
        tf_candidates.append(tf)
        tf //= 2
    if max_f_tile is not None:
        allowed = [t for t in tf_candidates if t <= max_f_tile]
        tf_candidates = allowed or [tf_candidates[-1]]

    for tf in tf_candidates:
        k_tiled = tf != Fp
        for tb in tb_candidates:
            if _vmem_estimate(tb, tf, Fp, Hp, x_item, c_item, k_tiled) <= budget:
                return tb, tf, k_tiled
    # TODO(synk): if even the smallest F tile overflows VMEM (huge H), an
    # additional H (output-column) tiling axis would be required.
    tf = tf_candidates[-1]
    return tb_candidates[-1], tf, tf != Fp


def _resident_spec(shape, index_map):
    """Constant-index block: single-buffer it (fetched once, stays resident)."""
    try:
        return pl.BlockSpec(shape, index_map, pipeline_mode=pl.Buffered(buffer_count=1))
    except TypeError:   # older jax without pipeline_mode kwarg
        return pl.BlockSpec(shape, index_map)


# ---------------------------------------------------------------------------
# Wrapper
# ---------------------------------------------------------------------------

def adversarial_network_forward(x, params, *, block_b=None,
                                compute_dtype=jnp.bfloat16, max_f_tile=None):
    """x: [B, input_feature] -> [B, 1] float32 (eval-mode forward)."""
    w1, b1, w2, b2, w3, b3 = params
    B, F = x.shape
    H = w1.shape[1]

    LANE = 128                                   # pad F/H to lane (and MXU) multiples
    Fp = _round_up(F, LANE)
    Hp = _round_up(H, LANE)

    c_item = np.dtype(compute_dtype).itemsize
    x_item = np.dtype(x.dtype).itemsize

    budget = _vmem_budget_bytes()
    if block_b is None:
        # Larger batch tiles on v5e/v6e (128 MiB VMEM); conservative on v7x (64 MiB).
        block_b = 2048 if budget >= 90 * 1024 * 1024 else 512

    tb, tf, k_tiled = _choose_tiling(B, Fp, Hp, x_item, c_item, budget,
                                     block_b, max_f_tile)

    # --- parameter prep (zero-padded hidden/feature units contribute exactly 0) ---
    w1p = jnp.pad(jnp.asarray(w1, compute_dtype), ((0, Fp - F), (0, Hp - H)))
    w2p = jnp.pad(jnp.asarray(w2, compute_dtype), ((0, Hp - H), (0, Hp - H)))
    b1p = jnp.pad(jnp.asarray(b1, jnp.float32).reshape(1, H), ((0, 0), (0, Hp - H)))
    b2p = jnp.pad(jnp.asarray(b2, jnp.float32).reshape(1, H), ((0, 0), (0, Hp - H)))
    w3p = jnp.pad(jnp.asarray(w3, jnp.float32).reshape(1, H), ((0, 0), (0, Hp - H)))
    b3p = jnp.asarray(b3, jnp.float32).reshape(1, 1)

    # --- batch / feature padding of the streamed input (x dtype passes through;
    #     feed bf16 from the producer to halve the stream, no cast inserted here) ---
    b_pad = _round_up(B, tb)
    if b_pad != B or Fp != F:
        x = jnp.pad(x, ((0, b_pad - B), (0, Fp - F)))

    num_b = b_pad // tb
    num_k = Fp // tf if k_tiled else 1
    cost = pl.CostEstimate(
        flops=2 * b_pad * (Fp * Hp + Hp * Hp + Hp),
        transcendentals=2 * b_pad,                              # sigmoid = exp + recip
        bytes_accessed=int(b_pad * Fp * x_item                  # stream x
                           + (num_b if k_tiled else 1) * Fp * Hp * c_item
                           + Hp * Hp * c_item
                           + (3 * Hp + 1) * 4
                           + b_pad * 4),
    )

    smem_spec = pl.BlockSpec(memory_space=pltpu.MemorySpace.SMEM)   # b3 scalar

    if not k_tiled:
        grid = (num_b,)
        in_specs = [
            pl.BlockSpec((tb, Fp), lambda i: (i, 0)),               # x: streamed, 2 bufs
            _resident_spec((Fp, Hp), lambda i: (0, 0)),             # W1 resident
            _resident_spec((1, Hp), lambda i: (0, 0)),              # b1
            _resident_spec((Hp, Hp), lambda i: (0, 0)),             # W2 resident
            _resident_spec((1, Hp), lambda i: (0, 0)),              # b2
            _resident_spec((1, Hp), lambda i: (0, 0)),              # w3 row
            smem_spec,                                              # b3 scalar (SMEM)
        ]
        out_specs = pl.BlockSpec((tb, 1), lambda i: (i, 0))
        scratch = []
        kernel = _mlp_kernel
        dims = ("parallel",)
    else:
        grid = (num_b, num_k)
        in_specs = [
            pl.BlockSpec((tb, tf), lambda i, k: (i, k)),            # x tile
            pl.BlockSpec((tf, Hp), lambda i, k: (k, 0)),            # W1 tile: streamed over F
            _resident_spec((1, Hp), lambda i, k: (0, 0)),           # b1
            _resident_spec((Hp, Hp), lambda i, k: (0, 0)),          # W2 resident
            _resident_spec((1, Hp), lambda i, k: (0, 0)),           # b2
            _resident_spec((1, Hp), lambda i, k: (0, 0)),           # w3 row
            smem_spec,                                              # b3 scalar (SMEM)
        ]
        out_specs = pl.BlockSpec((tb, 1), lambda i, k: (i, 0))
        scratch = [pltpu.VMEM((tb, Hp), jnp.float32)]               # layer-1 f32 accumulator
        kernel = _mlp_kernel_ktiled
        dims = ("parallel", "arbitrary")

    # TODO(synk): on v7x, profile that the "parallel" batch axis is actually split
    # across the 2 TensorCores; if not, switch to pltpu.CORE_PARALLEL / core_map.
    out = pl.pallas_call(
        kernel,
        out_shape=jax.ShapeDtypeStruct((b_pad, 1), jnp.float32),
        grid_spec=pltpu.PrefetchScalarGridSpec(
            num_scalar_prefetch=0,
            grid=grid,
            in_specs=in_specs,
            out_specs=out_specs,
            scratch_shapes=scratch,
        ),
        compiler_params=pltpu.CompilerParams(
            dimension_semantics=dims,
            vmem_limit_bytes=int(budget),
        ),
        cost_estimate=cost,
    )(x, w1p, b1p, w2p, b2p, w3p, b3p)
    return out[:B]
    # TODO(synk): x.register_hook(grl_hook(coeff)) is a backward-pass gradient
    # reversal with no forward-pass equivalent; dropout is identity in eval mode.


# ---------------------------------------------------------------------------
# Reference / init / test
# ---------------------------------------------------------------------------

def init_params(key, input_feature, hidden_size):
    """Matches init_weights: xavier_normal_ weights, zero biases."""
    k1, k2, k3 = jax.random.split(key, 3)

    def xavier_normal(k, fan_in, fan_out):
        std = float(np.sqrt(2.0 / (fan_in + fan_out)))
        # stored as (in, out) so the kernel computes x @ W (== PyTorch x @ W.T)
        return jax.random.normal(k, (fan_in, fan_out), dtype=jnp.float32) * std

    w1 = xavier_normal(k1, input_feature, hidden_size)
    b1 = jnp.zeros((1, hidden_size), dtype=jnp.float32)
    w2 = xavier_normal(k2, hidden_size, hidden_size)
    b2 = jnp.zeros((1, hidden_size), dtype=jnp.float32)
    w3 = xavier_normal(k3, hidden_size, 1)
    b3 = jnp.zeros((1, 1), dtype=jnp.float32)
    return (w1, b1, w2, b2, w3, b3)


def reference_forward(x, params):
    w1, b1, w2, b2, w3, b3 = params
    h1 = jnp.maximum(x @ w1 + b1, 0.0)
    h2 = jnp.maximum(h1 @ w2 + b2, 0.0)
    return jax.nn.sigmoid(h2 @ w3 + b3)


if __name__ == "__main__":
    batch = 20
    input_feature = 256
    hidden_size = 32

    key = jax.random.PRNGKey(0)
    kx, kp = jax.random.split(key)
    x = jax.random.normal(kx, (batch, input_feature), dtype=jnp.float32)
    params = init_params(kp, input_feature, hidden_size)

    _ = calc_coeff(iter_num=0)   # forward output does not depend on it (eval mode)
    y_ref = reference_forward(x, params)

    # 1) fast path (resident weights), full-f32 MXU
    y_f32 = jax.block_until_ready(
        adversarial_network_forward(x, params, compute_dtype=jnp.float32))
    assert y_f32.shape == (batch, 1)
    np.testing.assert_allclose(np.asarray(y_f32), np.asarray(y_ref), rtol=1e-5, atol=1e-5)

    # 2) fast path, bf16 MXU (default)
    y_bf16 = jax.block_until_ready(adversarial_network_forward(x, params))
    np.testing.assert_allclose(np.asarray(y_bf16), np.asarray(y_ref), rtol=2e-2, atol=2e-2)

    # 3) forced K-tiled fallback (two F tiles of 128), f32
    y_kt = jax.block_until_ready(
        adversarial_network_forward(x, params, compute_dtype=jnp.float32, max_f_tile=128))
    np.testing.assert_allclose(np.asarray(y_kt), np.asarray(y_ref), rtol=1e-5, atol=1e-5)

    # 4) multi-batch-tile + batch-padding path, f32
    xb = jax.random.normal(kx, (300, input_feature), dtype=jnp.float32)
    yb = jax.block_until_ready(
        adversarial_network_forward(xb, params, compute_dtype=jnp.float32, block_b=128))
    np.testing.assert_allclose(np.asarray(yb), np.asarray(reference_forward(xb, params)),
                               rtol=1e-5, atol=1e-5)

    print("KERNEL_OK")
</pallas_src>

<mosaic_0001>
module attributes {stable_mosaic.version = 11 : i64} {
  func.func @_mlp_kernel(%arg0: i32, %arg1: memref<32x256xf32, #tpu.memory_space<vmem>>, %arg2: memref<256x128xf32, #tpu.memory_space<vmem>>, %arg3: memref<1x128xf32, #tpu.memory_space<vmem>>, %arg4: memref<128x128xf32, #tpu.memory_space<vmem>>, %arg5: memref<1x128xf32, #tpu.memory_space<vmem>>, %arg6: memref<1x128xf32, #tpu.memory_space<vmem>>, %arg7: memref<1x1xf32, #tpu.memory_space<smem>>, %arg8: memref<32x1xf32, #tpu.memory_space<vmem>>) attributes {dimension_semantics = [#tpu.dimension_semantics<parallel>], iteration_bounds = array<i64: 1>, scalar_prefetch = 0 : i64, scratch_operands = 0 : i64, tpu.core_type = #tpu.core_type<tc>, window_params = [{transform_indices = @transform_0, window_bounds = array<i64: 32, 256>}, {pipeline_mode = #tpu.pipeline_mode<synchronous>, transform_indices = @transform_1, window_bounds = array<i64: 256, 128>}, {pipeline_mode = #tpu.pipeline_mode<synchronous>, transform_indices = @transform_2, window_bounds = array<i64: 1, 128>}, {pipeline_mode = #tpu.pipeline_mode<synchronous>, transform_indices = @transform_3, window_bounds = array<i64: 128, 128>}, {pipeline_mode = #tpu.pipeline_mode<synchronous>, transform_indices = @transform_4, window_bounds = array<i64: 1, 128>}, {pipeline_mode = #tpu.pipeline_mode<synchronous>, transform_indices = @transform_5, window_bounds = array<i64: 1, 128>}, {transform_indices = @transform_6, window_bounds = array<i64: 1, 1>}, {transform_indices = @transform_7, window_bounds = array<i64: 32, 1>}]} {
    %c0 = arith.constant 0 : index
    %c0_0 = arith.constant 0 : index
    %0 = vector.load %arg1[%c0, %c0_0] : memref<32x256xf32, #tpu.memory_space<vmem>>, vector<32x256xf32>
    %c0_1 = arith.constant 0 : index
    %c0_2 = arith.constant 0 : index
    %1 = vector.load %arg2[%c0_1, %c0_2] : memref<256x128xf32, #tpu.memory_space<vmem>>, vector<256x128xf32>
    %cst = arith.constant dense<0.000000e+00> : vector<32x128xf32>
    %2 = tpu.matmul %0, %1, %cst {dimension_numbers = #tpu.dot_dimension_numbers<[1], [0], [0], [1], [0, 0, 1, 1], [], []>} : vector<32x256xf32>, vector<256x128xf32>, vector<32x128xf32> -> vector<32x128xf32>
    %c0_3 = arith.constant 0 : index
    %c0_4 = arith.constant 0 : index
    %3 = vector.load %arg3[%c0_3, %c0_4] : memref<1x128xf32, #tpu.memory_space<vmem>>, vector<1x128xf32>
    %4 = vector.broadcast %3 : vector<1x128xf32> to vector<32x128xf32>
    %5 = arith.addf %2, %4 : vector<32x128xf32>
    %cst_5 = arith.constant 0.000000e+00 : f32
    %6 = vector.broadcast %cst_5 : f32 to vector<32x128xf32>
    %7 = arith.maximumf %5, %6 : vector<32x128xf32>
    %c0_6 = arith.constant 0 : index
    %c0_7 = arith.constant 0 : index
    %8 = vector.load %arg4[%c0_6, %c0_7] : memref<128x128xf32, #tpu.memory_space<vmem>>, vector<128x128xf32>
    %cst_8 = arith.constant dense<0.000000e+00> : vector<32x128xf32>
    %9 = tpu.matmul %7, %8, %cst_8 {dimension_numbers = #tpu.dot_dimension_numbers<[1], [0], [0], [1], [0, 0, 1, 1], [], []>} : vector<32x128xf32>, vector<128x128xf32>, vector<32x128xf32> -> vector<32x128xf32>
    %c0_9 = arith.constant 0 : index
    %c0_10 = arith.constant 0 : index
    %10 = vector.load %arg5[%c0_9, %c0_10] : memref<1x128xf32, #tpu.memory_space<vmem>>, vector<1x128xf32>
    %11 = vector.broadcast %10 : vector<1x128xf32> to vector<32x128xf32>
    %12 = arith.addf %9, %11 : vector<32x128xf32>
    %cst_11 = arith.constant 0.000000e+00 : f32
    %13 = vector.broadcast %cst_11 : f32 to vector<32x128xf32>
    %14 = arith.maximumf %12, %13 : vector<32x128xf32>
    %c0_12 = arith.constant 0 : index
    %c0_13 = arith.constant 0 : index
    %15 = vector.load %arg6[%c0_12, %c0_13] : memref<1x128xf32, #tpu.memory_space<vmem>>, vector<1x128xf32>
    %16 = vector.broadcast %15 : vector<1x128xf32> to vector<32x128xf32>
    %17 = arith.mulf %14, %16 : vector<32x128xf32>
    %cst_14 = arith.constant dense<0.000000e+00> : vector<32xf32>
    %18 = vector.multi_reduction <add>, %17, %cst_14 [1] : vector<32x128xf32> to vector<32xf32>
    %19 = vector.shape_cast %18 : vector<32xf32> to vector<32x1xf32>
    %c0_15 = arith.constant 0 : index
    %c0_16 = arith.constant 0 : index
    %20 = memref.load %arg7[%c0_15, %c0_16] : memref<1x1xf32, #tpu.memory_space<smem>>
    %21 = vector.broadcast %20 : f32 to vector<32x1xf32>
    %22 = arith.addf %19, %21 : vector<32x1xf32>
    %23 = arith.negf %22 : vector<32x1xf32>
    %24 = math.exp %23 : vector<32x1xf32>
    %cst_17 = arith.constant 1.000000e+00 : f32
    %25 = vector.broadcast %cst_17 : f32 to vector<32x1xf32>
    %26 = arith.addf %25, %24 : vector<32x1xf32>
    %27 = arith.divf %25, %26 : vector<32x1xf32>
    %c0_18 = arith.constant 0 : index
    %c0_19 = arith.constant 0 : index
    %28 = vector.load %arg8[%c0_18, %c0_19] : memref<32x1xf32, #tpu.memory_space<vmem>>, vector<32x1xf32>
    tpu.vector_store %arg8[%c0_18, %c0_19], %27 {strides = array<i32>} : memref<32x1xf32, #tpu.memory_space<vmem>>, vector<32x1xf32>,
    return
  }
  func.func @transform_0(%arg0: i32) -> (i32, i32) {
    %c0_i32 = arith.constant 0 : i32
    %c0_i32_0 = arith.constant 0 : i32
    return %arg0, %c0_i32 : i32, i32
  }
  func.func @transform_1(%arg0: i32) -> (i32, i32) {
    %c0_i32 = arith.constant 0 : i32
    %c0_i32_0 = arith.constant 0 : i32
    %c0_i32_1 = arith.constant 0 : i32
    return %c0_i32, %c0_i32_0 : i32, i32
  }
  func.func @transform_2(%arg0: i32) -> (i32, i32) {
    %c0_i32 = arith.constant 0 : i32
    %c0_i32_0 = arith.constant 0 : i32
    %c0_i32_1 = arith.constant 0 : i32
    return %c0_i32, %c0_i32_0 : i32, i32
  }
  func.func @transform_3(%arg0: i32) -> (i32, i32) {
    %c0_i32 = arith.constant 0 : i32
    %c0_i32_0 = arith.constant 0 : i32
    %c0_i32_1 = arith.constant 0 : i32
    return %c0_i32, %c0_i32_0 : i32, i32
  }
  func.func @transform_4(%arg0: i32) -> (i32, i32) {
    %c0_i32 = arith.constant 0 : i32
    %c0_i32_0 = arith.constant 0 : i32
    %c0_i32_1 = arith.constant 0 : i32
    return %c0_i32, %c0_i32_0 : i32, i32
  }
  func.func @transform_5(%arg0: i32) -> (i32, i32) {
    %c0_i32 = arith.constant 0 : i32
    %c0_i32_0 = arith.constant 0 : i32
    %c0_i32_1 = arith.constant 0 : i32
    return %c0_i32, %c0_i32_0 : i32, i32
  }
  func.func @transform_6(%arg0: i32) -> (i32, i32) {
    %c0_i32 = arith.constant 0 : i32
    %c0_i32_0 = arith.constant 0 : i32
    %c0_i32_1 = arith.constant 0 : i32
    return %c0_i32, %c0_i32_0 : i32, i32
  }
  func.func @transform_7(%arg0: i32) -> (i32, i32) {
    %c0_i32 = arith.constant 0 : i32
    %c0_i32_0 = arith.constant 0 : i32
    return %arg0, %c0_i32 : i32, i32
  }
}

</mosaic_0001>

<bundles_post_ra>
// kernel: tpu_custom_call.1
= control target key start
LH: loop header
LB: loop body
LE: loop exit
PB: predicated region body
PF: predicated region fallthrough
CT: control target
= control target key end

     0   :  { %13 = vsyncpa [#allocation4], 0  ;;  %s652_s0 = inlined_call_operand.hbm [shape: f32[32,256], index: 0, kind: input, shape index: {}]   ;;  %s653_s1 = inlined_call_operand.hbm [shape: f32[256,128], index: 1, kind: input, shape index: {}]   ;;  %s654_s2 = inlined_call_operand.vmem [shape: f32[1,128], index: 2, kind: input, shape index: {}]   ;;  %s655_s3 = inlined_call_operand.hbm [shape: f32[128,128], index: 3, kind: input, shape index: {}]   ;;  %s656_s4 = inlined_call_operand.vmem [shape: f32[1,128], index: 4, kind: input, shape index: {}]   ;;  %s657_s5 = inlined_call_operand.vmem [shape: f32[1,128], index: 5, kind: input, shape index: {}]   ;;  %s658_s6 = inlined_call_operand.<no memory space> [shape: f32[1,1], index: 6, kind: input, shape index: {}]   ;;  %s659_s7 = inlined_call_operand.vmem [shape: f32[32,1], index: 7, kind: output, shape index: {}]  }
   0x1   :  { %14 = vsyncpa [#allocation6], 0  ;;  %s572_s24 = smov [#allocation5]  }
   0x2   :  { %s32_s25 = sshll.u32 %s572_s24, 4  ;;  %s33_s25 = int_to_ptr.vmem [resolvable:$true] %s32_s25 }
   0x3   :  { %s516_s26 = scalar_lea.vmem %s33_s25, 4096  ;;  %p521_p1 = scmp.lt.s32.totalorder %s33_s25, %s33_s25 }
   0x4   :  { %p517_p0 = scmp.ne.s32.totalorder %s33_s25, %s516_s26  ;;  %p522_p2 = scmp.lt.s32.totalorder %s516_s26, %s516_s26 }
   0x6   :  { %p523_p3 = por %p522_p2, %p521_p1 }
   0x8   :  { %p524_p4 = pnand %p523_p3, %p517_p0 }
   0xa   :  { %527 = shalt.err (!%p524_p4)
}
   0xb   :  { %s573_s27 = smov 128   ;;  %s574_s28 = smov 8  }
   0xc   :  { %38 = dma.hbm_to_vmem [thread:$0]  %s653_s1, 4096, %s33_s25, [#allocation6], %s573_s27, %s573_s27, %s574_s28  }
   0xd   :  { %s575_s8 = smov [#allocation3]  }
   0xe   :  { %s20_s9 = sshll.u32 %s575_s8, 4  ;;  %s21_s9 = int_to_ptr.vmem [resolvable:$true] %s20_s9 }
   0xf   :  { %s536_s10 = scalar_lea.vmem %s21_s9, 1024  ;;  %p541_p6 = scmp.lt.s32.totalorder %s21_s9, %s21_s9 }
  0x10   :  { %p537_p5 = scmp.ne.s32.totalorder %s21_s9, %s536_s10  ;;  %p542_p7 = scmp.lt.s32.totalorder %s536_s10, %s536_s10 }
  0x12   :  { %p543_p8 = por %p542_p7, %p541_p6 }
  0x14   :  { %p544_p9 = pnand %p543_p8, %p537_p5 }
  0x16   :  { %547 = shalt.err (!%p544_p9)
}
  0x17   :  { %s576_s11 = smov 256   ;;  %s577_s12 = smov 16  }
  0x18   :  { %26 = dma.hbm_to_vmem [thread:$0]  %s652_s0, 1024, %s21_s9, [#allocation4], %s576_s11, %s576_s11, %s577_s12  }
  0x19   :  { %s578_s15 = smov [#allocation7]  }
  0x1a   :  { %s46_s16 = sshll.u32 %s578_s15, 4  ;;  %s47_s16 = int_to_ptr.vmem [resolvable:$true] %s46_s16 }
  0x1b   :  { %s556_s1 = scalar_lea.vmem %s47_s16, 2048  ;;  %p561_p11 = scmp.lt.s32.totalorder %s47_s16, %s47_s16 }
  0x1c   :  { %p557_p10 = scmp.ne.s32.totalorder %s47_s16, %s556_s1  ;;  %p562_p12 = scmp.lt.s32.totalorder %s556_s1, %s556_s1 }
  0x1e   :  { %p563_p13 = por %p562_p12, %p561_p11 }
  0x20   :  { %p564_p0 = pnand %p563_p13, %p557_p10 }
  0x22   :  { %567 = shalt.err (!%p564_p0)
}
  0x23   :  { %52 = dma.hbm_to_vmem [thread:$0]  %s655_s3, 2048, %s47_s16, [#allocation6], %s573_s27, %s573_s27, %s574_s28  }
  0x24   :  { %568 = dma.done.wait [#allocation4], 1024  }
  0x25   :  { %569 = vsyncadd [#allocation4], 4294966272 }
  0x26   :  { %570 = dma.done.wait [#allocation6], 6144  }
  0x27   :  { %571 = vsyncadd [#allocation6], 4294961152  ;;  %v107_v0 = vld [vmem:[#allocation5 + $0xf8] sm:$0xff]  ;;  %v106_v2 = vld [vmem:[#allocation5 + $0xf0] sm:$0xff]  ;;  %vm365_vm0 = vcmask 7168  }
  0x28   :  { %v91_v1 = vld [vmem:[#allocation5 + $0x78] sm:$0xff]  ;;  %383 = vmatprep.subr.mxu0 %v107_v0  ;;  %v90_v3 = vld [vmem:[#allocation5 + $0x70] sm:$0xff]  ;;  %v105_v4 = vld [vmem:[#allocation5 + $0xe8] sm:$0xff] }
  0x29   :  { %384 = vmatpush3.msra.mxu0 %v91_v1  ;;  %v89_v5 = vld [vmem:[#allocation5 + $0x68] sm:$0xff]  ;;  %v104_v6 = vld [vmem:[#allocation5 + $0xe0] sm:$0xff]  ;;  %v103_v8 = vld [vmem:[#allocation5 + $0xd8] sm:$0xff] }
  0x2a   :  { %385 = vmatprep.subr.mxu0 %v106_v2  ;;  %v88_v7 = vld [vmem:[#allocation5 + $0x60] sm:$0xff]  ;;  %v87_v9 = vld [vmem:[#allocation5 + $0x58] sm:$0xff]  ;;  %v102_v10 = vld [vmem:[#allocation5 + $0xd0] sm:$0xff] }
  0x2b   :  { %386 = vmatpush3.msra.mxu0 %v90_v3  ;;  %v86_v11 = vld [vmem:[#allocation5 + $0x50] sm:$0xff]  ;;  %v101_v12 = vld [vmem:[#allocation5 + $0xc8] sm:$0xff]  ;;  %v100_v15 = vld [vmem:[#allocation5 + $0xc0] sm:$0xff] }
  0x2c   :  { %387 = vmatprep.subr.mxu0 %v105_v4  ;;  %v69_v13 = vld [vmem:[#allocation3 + $0x8] sm:$0xff]  ;;  %v84_v16 = vld [vmem:[#allocation5 + $0x40] sm:$0xff]  ;;  %v219_v17 = vld [vmem:[#allocation7 + $0x78] sm:$0xff] }
  0x2d   :  { %388 = vmatpush3.msra.mxu0 %v89_v5  ;;  %v85_v14 = vld [vmem:[#allocation5 + $0x48] sm:$0xff]  ;;  %179 = vmatprep.mubr.f32.mxu0 %v69_v13  ;;  %v218_v18 = vld [vmem:[#allocation7 + $0x70] sm:$0xff]  ;;  %v99_v19 = vld [vmem:[#allocation5 + $0xb8] sm:$0xff] }
  0x2e   :  { %389 = vmatprep.subr.mxu0 %v104_v6  ;;  %447 = vmatprep.subr.mxu1 %v219_v17  ;;  %v83_v20 = vld [vmem:[#allocation5 + $0x38] sm:$0xff]  ;;  %v217_v21 = vld [vmem:[#allocation7 + $0x68] sm:$0xff]  ;;  %v98_v22 = vld [vmem:[#allocation5 + $0xb0] sm:$0xff] }
  0x2f   :  { %390 = vmatpush3.msra.mxu0 %v88_v7  ;;  %448 = vmatpush3.msra.mxu1 %v219_v17  ;;  %v82_v23 = vld [vmem:[#allocation5 + $0x30] sm:$0xff]  ;;  %v216_v24 = vld [vmem:[#allocation7 + $0x60] sm:$0xff]  ;;  %v97_v25 = vld [vmem:[#allocation5 + $0xa8] sm:$0xff] }
  0x30   :  { %391 = vmatprep.subr.mxu0 %v103_v8  ;;  %449 = vmatprep.subr.mxu1 %v218_v18  ;;  %v81_v26 = vld [vmem:[#allocation5 + $0x28] sm:$0xff]  ;;  %v215_v27 = vld [vmem:[#allocation7 + $0x58] sm:$0xff]  ;;  %v96_v28 = vld [vmem:[#allocation5 + $0xa0] sm:$0xff] }
  0x31   :  { %392 = vmatpush3.msra.mxu0 %v87_v9  ;;  %450 = vmatpush3.msra.mxu1 %v218_v18  ;;  %v80_v29 = vld [vmem:[#allocation5 + $0x20] sm:$0xff]  ;;  %v214_v30 = vld [vmem:[#allocation7 + $0x50] sm:$0xff]  ;;  %v95_v31 = vld [vmem:[#allocation5 + $0x98] sm:$0xff] }
  0x32   :  { %393 = vmatprep.subr.mxu0 %v102_v10  ;;  %451 = vmatprep.subr.mxu1 %v217_v21  ;;  %v79_v32 = vld [vmem:[#allocation5 + $0x18] sm:$0xff]  ;;  %v213_v33 = vld [vmem:[#allocation7 + $0x48] sm:$0xff]  ;;  %v94_v34 = vld [vmem:[#allocation5 + $0x90] sm:$0xff] }
  0x33   :  { %394 = vmatpush3.msra.mxu0 %v86_v11  ;;  %452 = vmatpush3.msra.mxu1 %v217_v21  ;;  %v78_v35 = vld [vmem:[#allocation5 + $0x10] sm:$0xff]  ;;  %v212_v36 = vld [vmem:[#allocation7 + $0x40] sm:$0xff]  ;;  %v93_v37 = vld [vmem:[#allocation5 + $0x88] sm:$0xff] }
  0x34   :  { %395 = vmatprep.subr.mxu0 %v101_v12  ;;  %453 = vmatprep.subr.mxu1 %v216_v24  ;;  %v77_v38 = vld [vmem:[#allocation5 + $0x8] sm:$0xff]  ;;  %v211_v39 = vld [vmem:[#allocation7 + $0x38] sm:$0xff]  ;;  %v92_v40 = vld [vmem:[#allocation5 + $0x80] sm:$0xff] }
  0x35   :  { %396 = vmatpush3.msra.mxu0 %v85_v14  ;;  %454 = vmatpush3.msra.mxu1 %v216_v24  ;;  %v76_v41 = vld [vmem:[#allocation5] sm:$0xff]  ;;  %v210_v42 = vld [vmem:[#allocation7 + $0x30] sm:$0xff]  ;;  %v71_v44 = vld [vmem:[#allocation3 + $0x18] sm:$0xff] }
  0x36   :  { %397 = vmatprep.subr.mxu0 %v100_v15  ;;  %455 = vmatprep.subr.mxu1 %v215_v27  ;;  %v68_v43 = vld [vmem:[#allocation3] sm:$0xff]  ;;  %v70_v45 = vld [vmem:[#allocation3 + $0x10] sm:$0xff]  ;;  %v73_v46 = vld [vmem:[#allocation3 + $0x28] sm:$0xff] }
  0x37   :  { %398 = vmatpush3.msra.mxu0 %v84_v16  ;;  %456 = vmatpush3.msra.mxu1 %v215_v27  ;;  %v72_v47 = vld [vmem:[#allocation3 + $0x20] sm:$0xff]  ;;  %v75_v48 = vld [vmem:[#allocation3 + $0x38] sm:$0xff]  ;;  %v74_v49 = vld [vmem:[#allocation3 + $0x30] sm:$0xff] }
  0x38   :  { %399 = vmatprep.subr.mxu0 %v99_v19  ;;  %457 = vmatprep.subr.mxu1 %v214_v30  ;;  %v209_v50 = vld [vmem:[#allocation7 + $0x28] sm:$0xff]  ;;  %v208_v51 = vld [vmem:[#allocation7 + $0x20] sm:$0xff]  ;;  %v207_v52 = vld [vmem:[#allocation7 + $0x18] sm:$0xff] }
  0x39   :  { %400 = vmatpush3.msra.mxu0 %v83_v20  ;;  %458 = vmatpush3.msra.mxu1 %v214_v30  ;;  %v206_v53 = vld [vmem:[#allocation7 + $0x10] sm:$0xff]  ;;  %v205_v54 = vld [vmem:[#allocation7 + $0x8] sm:$0xff]  ;;  %v204_v55 = vld [vmem:[#allocation7] sm:$0xff] }
  0x3a   :  { %401 = vmatprep.subr.mxu0 %v98_v22  ;;  %459 = vmatprep.subr.mxu1 %v213_v33  ;;  %v376_v58 = vld [vmem:[%s654_s2] ss:$0 sm:$0xff] }
  0x3b   :  { %402 = vmatpush3.msra.mxu0 %v82_v23  ;;  %460 = vmatpush3.msra.mxu1 %v213_v33  ;;  %v377_v14 = vld [vmem:[%s656_s4] ss:$0 sm:$0xff] }
  0x3c   :  { %403 = vmatprep.subr.mxu0 %v97_v25  ;;  %461 = vmatprep.subr.mxu1 %v212_v36  ;;  %v378_v19 = vld [vmem:[%s657_s5] ss:$0 sm:$0xff] }
  0x3d   :  { %404 = vmatpush3.msra.mxu0 %v81_v26  ;;  %462 = vmatpush3.msra.mxu1 %v212_v36 }
  0x3e   :  { %405 = vmatprep.subr.mxu0 %v96_v28  ;;  %463 = vmatprep.subr.mxu1 %v211_v39 }
  0x3f   :  { %406 = vmatpush3.msra.mxu0 %v80_v29  ;;  %464 = vmatpush3.msra.mxu1 %v211_v39 }
  0x40   :  { %407 = vmatprep.subr.mxu0 %v95_v31  ;;  %465 = vmatprep.subr.mxu1 %v210_v42  ;;  %v336_v31 = vstv %s658_s6 }
  0x41   :  { %408 = vmatpush3.msra.mxu0 %v79_v32  ;;  %466 = vmatpush3.msra.mxu1 %v210_v42 }
  0x42   :  { %409 = vmatprep.subr.mxu0 %v94_v34  ;;  %467 = vmatprep.subr.mxu1 %v209_v50 }
  0x43   :  { %410 = vmatpush3.msra.mxu0 %v78_v35  ;;  %468 = vmatpush3.msra.mxu1 %v209_v50 }
  0x44   :  { %411 = vmatprep.subr.mxu0 %v93_v37  ;;  %469 = vmatprep.subr.mxu1 %v208_v51 }
  0x45   :  { %412 = vmatpush3.msra.mxu0 %v77_v38  ;;  %470 = vmatpush3.msra.mxu1 %v208_v51 }
  0x46   :  { %413 = vmatprep.subr.mxu0 %v92_v40  ;;  %471 = vmatprep.subr.mxu1 %v207_v52 }
  0x47   :  { %414 = vmatpush3.msra.mxu0 %v76_v41  ;;  %472 = vmatpush3.msra.mxu1 %v207_v52 }
  0x48   :  { %180 = vmatmul.mubr.f32.vlgmr.msra.gmra.mxu0 %v68_v43  ;;  %473 = vmatprep.subr.mxu1 %v206_v53 }
  0x49   :  { %184 = vmatprep.mubr.f32.mxu0 %v71_v44  ;;  %474 = vmatpush3.msra.mxu1 %v206_v53 }
  0x4a   :  { %475 = vmatprep.subr.mxu1 %v205_v54 }
  0x4b   :  { %476 = vmatpush3.msra.mxu1 %v205_v54 }
  0x4c   :  { %185 = vmatmul.mubr.f32.gmra.mxu0 %v70_v45  ;;  %477 = vmatprep.subr.mxu1 %v204_v55 }
  0x4d   :  { %189 = vmatprep.mubr.f32.mxu0 %v73_v46  ;;  %478 = vmatpush3.msra.mxu1 %v204_v55 }
  0x50   :  { %190 = vmatmul.mubr.f32.gmra.mxu0 %v72_v47 }
  0x51   :  { %194 = vmatprep.mubr.f32.mxu0 %v75_v48 }
  0x54   :  { %195 = vmatmul.mubr.f32.gmra.mxu0 %v74_v49 }
 0x108   :  { %v415_v56 = vpop.f32.mrf.mxu0 }
 0x10a   :  { %v416_v57 = vpop.f32.mrf.mxu0 }
 0x10b   :  { %v417_v59 = vadd.f32 %v416_v57, %v415_v56 }
 0x10c   :  { %v418_v60 = vpop.f32.mrf.mxu0 }
 0x10d   :  { %v182_v61 = vadd.f32 %v417_v59, %v376_v58 }
 0x10e   :  { %v419_v62 = vpop.f32.mrf.mxu0 }
 0x10f   :  { %v420_v63 = vadd.f32 %v419_v62, %v418_v60  ;;  %v200_v0 = vmax.f32 %v182_v61, 0.0 }
 0x110   :  { %v421_v1 = vpop.f32.mrf.mxu0 }
 0x111   :  { %v187_v2 = vadd.f32 %v420_v63, %v376_v58  ;;  %479 = vmatprep.mubr.f32.mxu1 %v200_v0 }
 0x112   :  { %v422_v3 = vpop.f32.mrf.mxu0 }
 0x113   :  { %v201_v4 = vmax.f32 %v187_v2, 0.0  ;;  %v423_v5 = vadd.f32 %v422_v3, %v421_v1 }
 0x114   :  { %v424_v6 = vpop.f32.mrf.mxu0 }
 0x115   :  { %v192_v7 = vadd.f32 %v423_v5, %v376_v58  ;;  %480 = vmatmul.mubr.f32.vlgmr.msra.gmra.mxu1 %v201_v4 }
 0x116   :  { %v425_v8 = vpop.f32.mrf.mxu0 }
 0x117   :  { %v202_v9 = vmax.f32 %v192_v7, 0.0  ;;  %v426_v10 = vadd.f32 %v425_v8, %v424_v6 }
 0x119   :  { %v197_v11 = vadd.f32 %v426_v10, %v376_v58  ;;  %482 = vmatprep.mubr.f32.mxu1 %v202_v9 }
 0x11b   :  { %v203_v12 = vmax.f32 %v197_v11, 0.0 }
 0x11d   :  { %483 = vmatmul.mubr.f32.gmra.mxu1 %v203_v12 }
 0x1d5   :  { %v481_v13 = vpop.f32.mrf.mxu1 }
 0x1d6   :  { %v299_v16 = vadd.f32 %v481_v13, %v377_v14 }
 0x1d7   :  { %v293_v15 = vpop.f32.mrf.mxu1 }
 0x1d8   :  { %v294_v17 = vadd.f32 %v377_v14, %v293_v15  ;;  %v313_v20 = vmax.f32 %v299_v16, 0.0 }
 0x1da   :  { %v312_v18 = vmax.f32 %v294_v17, 0.0  ;;  %v324_v26 = vmul.f32 %v378_v19, %v313_v20 }
 0x1dc   :  { %v323_v21 = vmul.f32 %v378_v19, %v312_v18 }
 0x1dd   :  { %v484_v22 = vpop.f32.mrf.mxu1 }
 0x1de   :  { %327 = vadd.xlane.f32.xlu0 %v323_v21  ;;  %v309_v24 = vadd.f32 %v484_v22, %v377_v14 }
 0x1df   :  { %v303_v23 = vpop.f32.mrf.mxu1 }
 0x1e0   :  { %v304_v25 = vadd.f32 %v377_v14, %v303_v23  ;;  %v315_v28 = vmax.f32 %v309_v24, 0.0 }
 0x1e2   :  { %v314_v27 = vmax.f32 %v304_v25, 0.0  ;;  %329 = vadd.xlane.f32.xlu0 %v324_v26  ;;  %v326_v30 = vmul.f32 %v378_v19, %v315_v28 }
 0x1e4   :  { %v325_v29 = vmul.f32 %v378_v19, %v314_v27 }
 0x1e6   :  { %331 = vadd.xlane.f32.xlu1 %v325_v29 }
 0x1ea   :  { %333 = vadd.xlane.f32.xlu1 %v326_v30 }
 0x267   :  { %v328_v32 = vpop.xlane.xlu0 %327 }
 0x268   :  { %v337_v33 = vadd.f32 %v336_v31, %v328_v32 }
 0x26a   :  { %v379_v34 = vmul.f32 -1.442695, %v337_v33 }
 0x26b   :  { %v330_v35 = vpop.xlane.xlu0 %329 }
 0x26c   :  { %492 = vpow2.f32 %v379_v34  ;;  %v338_v36 = vadd.f32 %v336_v31, %v330_v35 }
 0x26e   :  { %v380_v37 = vmul.f32 -1.442695, %v338_v36 }
 0x26f   :  { %v332_v38 = vpop.xlane.xlu1 %331 }
 0x270   :  { %494 = vpow2.f32 %v380_v37  ;;  %v339_v39 = vadd.f32 %v336_v31, %v332_v38 }
 0x272   :  { %v381_v40 = vmul.f32 -1.442695, %v339_v39 }
 0x273   :  { %v334_v41 = vpop.xlane.xlu1 %333 }
 0x274   :  { %496 = vpow2.f32 %v381_v40  ;;  %v340_v42 = vadd.f32 %v336_v31, %v334_v41 }
 0x276   :  { %v382_v43 = vmul.f32 -1.442695, %v340_v42 }
 0x278   :  { %498 = vpow2.f32 %v382_v43 }
 0x279   :  { %v493_v44 = vpop.eup %492 }
 0x27a   :  { %v353_v45 = vadd.f32 1.0, %v493_v44 }
 0x27c   :  { %500 = vrcp.f32 %v353_v45 }
 0x27d   :  { %v495_v46 = vpop.eup %494 }
 0x27e   :  { %v354_v47 = vadd.f32 1.0, %v495_v46 }
 0x280   :  { %502 = vrcp.f32 %v354_v47 }
 0x281   :  { %v497_v48 = vpop.eup %496 }
 0x282   :  { %v355_v49 = vadd.f32 1.0, %v497_v48 }
 0x284   :  { %504 = vrcp.f32 %v355_v49 }
 0x285   :  { %v499_v50 = vpop.eup %498 }
 0x286   :  { %v356_v51 = vadd.f32 1.0, %v499_v50 }
 0x288   :  { %506 = vrcp.f32 %v356_v51 }
 0x289   :  { %v501_v52 = vpop.eup %500 }
 0x28a   :  { %366 = vst.msk [vmem:[%s659_s7] sm:$0xff] %vm365_vm0, %v501_v52 }
 0x28d   :  { %v503_v53 = vpop.eup %502 }
 0x28e   :  { %367 = vst.msk [vmem:[%s659_s7 + $0x8] sm:$0xff] %vm365_vm0, %v503_v53 }
 0x291   :  { %v505_v54 = vpop.eup %504 }
 0x292   :  { %368 = vst.msk [vmem:[%s659_s7 + $0x10] sm:$0xff] %vm365_vm0, %v505_v54 }
 0x295   :  { %v507_v55 = vpop.eup %506 }
 0x296   :  { %369 = vst.msk [vmem:[%s659_s7 + $0x18] sm:$0xff] %vm365_vm0, %v507_v55 }
 0x297   :  { %374 = vsyncpa [#allocation4], 1 }
 0x298   :  { %375 = vsyncpa [#allocation6], 1 }

</bundles_post_ra>
